<compile_context>
chip_gen: v7x
topology: tpu7x:2x2x1
jax: 0.10.0
libtpu: 0.0.40
codegen_flags: <defaults>
</compile_context>

<pallas_src>
import functools

import jax
import jax.numpy as jnp
from jax.experimental import pallas as pl
from jax.experimental.pallas import tpu as pltpu

_LOG_EPS = -23.025850929940457  # log(1e-10): reproduces the 1e-10 denominator floor.


def _round_up(x, m):
    return (x + m - 1) // m * m


def _choose_tile_b(batch, feat_dim, classnum, max_tile_b,
                   vmem_budget=32 * 1024 * 1024):
    """Largest batch tile (multiple of 8) whose working set fits the VMEM budget."""
    per_row = (2 * 2 * feat_dim * 4     # mu + logvar tiles, double-buffered
               + 2 * 512                # (TB,1) labels padded to 128 lanes, dbl-buffered
               + feat_dim * 4           # f32 accumulator scratch
               + classnum * 4           # (TB,C) one-hot intermediate
               + 3 * feat_dim * 4)      # w / diff / reg temporaries
    fixed = classnum * feat_dim * 4     # resident, single-buffered weight table
    avail = max(vmem_budget - fixed, 8 * per_row)
    tile_b = min(int(max_tile_b), int(avail // per_row), _round_up(batch, 8))
    tile_b = max(8, (tile_b // 8) * 8)
    return int(tile_b)


def _reg_loss_kernel(mu_ref, logvar_ref, lab_ref, w_ref, out_ref, acc_ref,
                     *, tile_b, classnum):
    i = pl.program_id(1)  # batch-tile step within this core's share

    @pl.when(i == 0)
    def _():
        acc_ref[...] = jnp.zeros_like(acc_ref)

    mu = mu_ref[...].astype(jnp.float32)      # (TB, D)
    lv = logvar_ref[...].astype(jnp.float32)  # (TB, D)
    lab = lab_ref[...]                        # (TB, 1) int32

    # Gather W[labels] for this tile via a one-hot matmul on the otherwise-idle
    # MXU.  HIGHEST precision keeps the gathered f32 rows exact (a plain bf16
    # pass would round them).
    class_ids = jax.lax.broadcasted_iota(jnp.int32, (tile_b, classnum), 1)
    onehot = (class_ids == lab).astype(jnp.float32)                        # (TB, C)
    w = jnp.dot(onehot, w_ref[...], preferred_element_type=jnp.float32,
                precision=jax.lax.Precision.HIGHEST)                       # (TB, D)

    diff = w - mu
    # 1/(1e-10 + exp(lv)) == exp(-lv) up to the 1e-10 floor; clamping lv at
    # log(1e-10) reproduces the floor with a single EUP push (no rcp/Newton).
    inv = jnp.exp(-jnp.maximum(lv, _LOG_EPS))
    acc_ref[...] += (diff * diff * inv + lv) * 0.5

    @pl.when(i == pl.num_programs(1) - 1)
    def _():
        per_row = jnp.sum(acc_ref[...], axis=1, keepdims=True)   # (TB, 1)
        total = jnp.sum(per_row, axis=0, keepdims=True)          # (1, 1) partial sum
        # Lane-dense (8, 128) block: broadcast the partial sum; the wrapper
        # reads element [0, 0] of each core's block.
        out_ref[...] = jnp.broadcast_to(total, out_ref.shape)


@functools.partial(jax.jit, static_argnames=("max_tile_b",))
def reg_loss(mu, logvar, labels, fc_weights, max_tile_b=4096):
    B, D = mu.shape
    C = fc_weights.shape[0]

    tile_b = _choose_tile_b(B, D, C, _round_up(max_tile_b, 8))
    n_tiles = int(pl.cdiv(_round_up(B, 8), tile_b))
    n_cores = 2 if n_tiles >= 2 else 1          # v7x: split batch tiles across both TCs
    steps = int(pl.cdiv(n_tiles, n_cores))
    n_tiles = n_cores * steps
    b_pad = n_tiles * tile_b
    pad = b_pad - B

    labels = labels.astype(jnp.int32)
    if pad > 0:
        # Pad so padded rows contribute exactly 0:
        #   (W[0] - W[0])**2 * exp(-0) + 0 == 0   -> no in-kernel mask needed.
        mu = jnp.concatenate(
            [mu, jnp.broadcast_to(fc_weights[0:1].astype(mu.dtype), (pad, D))], axis=0)
        logvar = jnp.concatenate(
            [logvar, jnp.zeros((pad, D), logvar.dtype)], axis=0)
        labels = jnp.concatenate([labels, jnp.zeros((pad,), jnp.int32)], axis=0)
    lab2d = labels.reshape(b_pad, 1)

    # VMEM actually used: double-buffered mu/logvar/labels, single-buffered W,
    # accumulator scratch, one-hot + elementwise temporaries, plus headroom.
    vmem_need = (2 * 2 * tile_b * D * 4
                 + 2 * tile_b * 512
                 + C * D * 4
                 + tile_b * D * 4
                 + tile_b * C * 4
                 + 4 * tile_b * D * 4)
    vmem_limit = int(min(vmem_need * 5 // 4 + (2 << 20), 64 * 1024 * 1024))

    kernel = functools.partial(_reg_loss_kernel, tile_b=tile_b, classnum=C)

    parts = pl.pallas_call(
        kernel,
        out_shape=jax.ShapeDtypeStruct((n_cores * 8, 128), jnp.float32),
        grid_spec=pltpu.PrefetchScalarGridSpec(
            num_scalar_prefetch=0,
            grid=(n_cores, steps),
            in_specs=[
                pl.BlockSpec((tile_b, D), lambda c, i: (c * steps + i, 0)),   # mu tile
                pl.BlockSpec((tile_b, D), lambda c, i: (c * steps + i, 0)),   # logvar tile
                pl.BlockSpec((tile_b, 1), lambda c, i: (c * steps + i, 0)),   # labels tile
                # Resident weight table: constant block index, single-buffered.
                pl.BlockSpec((C, D), lambda c, i: (0, 0),
                             pipeline_mode=pl.Buffered(1)),
            ],
            out_specs=pl.BlockSpec((8, 128), lambda c, i: (c, 0)),            # per-core partial
            scratch_shapes=[pltpu.VMEM((tile_b, D), jnp.float32)],
        ),
        compiler_params=pltpu.CompilerParams(
            dimension_semantics=("parallel", "arbitrary"),
            vmem_limit_bytes=vmem_limit,
        ),
    )(mu, logvar, lab2d, fc_weights)

    # One partial sum per core (element [0, 0] of each core's block).
    return jnp.sum(parts[::8, 0]) / B


def reg_loss_reference(mu, logvar, labels, fc_weights):
    w = fc_weights[labels]
    fit = (w - mu) ** 2 / (1e-10 + jnp.exp(logvar))
    reg = (fit + logvar) / 2.0
    return jnp.mean(jnp.sum(reg, axis=1))


if __name__ == "__main__":
    # Small, deterministic setup consistent with RegLoss(feat_dim, classnum).
    feat_dim = 128
    classnum = 64
    batch = 8

    key = jax.random.PRNGKey(0)
    k_w, k_mu, k_lv, k_lab = jax.random.split(key, 4)

    fc_weights = jax.random.normal(k_w, (classnum, feat_dim), dtype=jnp.float32)
    mu = jax.random.normal(k_mu, (batch, feat_dim), dtype=jnp.float32)
    logvar = 0.1 * jax.random.normal(k_lv, (batch, feat_dim), dtype=jnp.float32)
    labels = jax.random.randint(k_lab, (batch,), 0, classnum, dtype=jnp.int32)

    loss = reg_loss(mu, logvar, labels, fc_weights)
    jax.block_until_ready(loss)
    ref = reg_loss_reference(mu, logvar, labels, fc_weights)
    assert jnp.allclose(loss, ref, rtol=1e-5, atol=1e-5), (loss, ref)

    # Second config: batch not a multiple of the tile + a tiny tile cap so the
    # grid has multiple steps and both the padding path and the 2-core split
    # (per-core partial sums) are exercised.
    batch2 = 20
    k_mu2, k_lv2, k_lab2 = jax.random.split(jax.random.PRNGKey(1), 3)
    mu2 = jax.random.normal(k_mu2, (batch2, feat_dim), dtype=jnp.float32)
    logvar2 = 0.1 * jax.random.normal(k_lv2, (batch2, feat_dim), dtype=jnp.float32)
    labels2 = jax.random.randint(k_lab2, (batch2,), 0, classnum, dtype=jnp.int32)

    loss2 = reg_loss(mu2, logvar2, labels2, fc_weights, max_tile_b=8)
    jax.block_until_ready(loss2)
    ref2 = reg_loss_reference(mu2, logvar2, labels2, fc_weights)
    assert jnp.allclose(loss2, ref2, rtol=1e-5, atol=1e-5), (loss2, ref2)

    print("KERNEL_OK")
</pallas_src>

<mosaic_0001>
module attributes {stable_mosaic.version = 11 : i64} {
  func.func @_reg_loss_kernel(%arg0: i32, %arg1: i32, %arg2: memref<8x128xf32, #tpu.memory_space<vmem>>, %arg3: memref<8x128xf32, #tpu.memory_space<vmem>>, %arg4: memref<8x1xi32, #tpu.memory_space<vmem>>, %arg5: memref<64x128xf32, #tpu.memory_space<vmem>>, %arg6: memref<8x128xf32, #tpu.memory_space<vmem>>, %arg7: memref<8x128xf32, #tpu.memory_space<vmem>>) attributes {dimension_semantics = [#tpu.dimension_semantics<parallel>, #tpu.dimension_semantics<arbitrary>], iteration_bounds = array<i64: 1, 1>, scalar_prefetch = 0 : i64, scratch_operands = 1 : i64, tpu.core_type = #tpu.core_type<tc>, window_params = [{transform_indices = @transform_0, window_bounds = array<i64: 8, 128>}, {transform_indices = @transform_1, window_bounds = array<i64: 8, 128>}, {transform_indices = @transform_2, window_bounds = array<i64: 8, 1>}, {pipeline_mode = #tpu.pipeline_mode<synchronous>, transform_indices = @transform_3, window_bounds = array<i64: 64, 128>}, {transform_indices = @transform_4, window_bounds = array<i64: 8, 128>}]} {
    %c0_i32 = arith.constant 0 : i32
    %0 = arith.cmpi eq, %arg1, %c0_i32 : i32
    %1 = arith.extui %0 : i1 to i32
    %c0_i32_0 = arith.constant 0 : i32
    %2 = arith.cmpi ne, %1, %c0_i32_0 : i32
    scf.if %2 {
      %cst_17 = arith.constant 0.000000e+00 : f32
      %30 = vector.broadcast %cst_17 : f32 to vector<8x128xf32>
      %c0_18 = arith.constant 0 : index
      %c0_19 = arith.constant 0 : index
      %31 = vector.load %arg7[%c0_18, %c0_19] : memref<8x128xf32, #tpu.memory_space<vmem>>, vector<8x128xf32>
      tpu.vector_store %arg7[%c0_18, %c0_19], %30 {strides = array<i32>} : memref<8x128xf32, #tpu.memory_space<vmem>>, vector<8x128xf32>,
    } else {
    }
    %c0 = arith.constant 0 : index
    %c0_1 = arith.constant 0 : index
    %3 = vector.load %arg2[%c0, %c0_1] : memref<8x128xf32, #tpu.memory_space<vmem>>, vector<8x128xf32>
    %c0_2 = arith.constant 0 : index
    %c0_3 = arith.constant 0 : index
    %4 = vector.load %arg3[%c0_2, %c0_3] : memref<8x128xf32, #tpu.memory_space<vmem>>, vector<8x128xf32>
    %c0_4 = arith.constant 0 : index
    %c0_5 = arith.constant 0 : index
    %5 = vector.load %arg4[%c0_4, %c0_5] : memref<8x1xi32, #tpu.memory_space<vmem>>, vector<8x1xi32>
    %6 = tpu.iota {dimensions = array<i32: 1>} : vector<8x64xi32>
    %7 = vector.broadcast %5 : vector<8x1xi32> to vector<8x64xi32>
    %8 = arith.cmpi eq, %6, %7 : vector<8x64xi32>
    %9 = arith.extui %8 : vector<8x64xi1> to vector<8x64xi32>
    %10 = arith.sitofp %9 : vector<8x64xi32> to vector<8x64xf32>
    %c0_6 = arith.constant 0 : index
    %c0_7 = arith.constant 0 : index
    %11 = vector.load %arg5[%c0_6, %c0_7] : memref<64x128xf32, #tpu.memory_space<vmem>>, vector<64x128xf32>
    %cst = arith.constant dense<0.000000e+00> : vector<8x128xf32>
    %12 = tpu.matmul %10, %11, %cst {dimension_numbers = #tpu.dot_dimension_numbers<[1], [0], [0], [1], [0, 0, 1, 1], [], []>, precision = #tpu.contract_precision<fp32>} : vector<8x64xf32>, vector<64x128xf32>, vector<8x128xf32> -> vector<8x128xf32>
    %13 = arith.subf %12, %3 : vector<8x128xf32>
    %cst_8 = arith.constant -23.0258503 : f32
    %14 = vector.broadcast %cst_8 : f32 to vector<8x128xf32>
    %15 = arith.maximumf %4, %14 : vector<8x128xf32>
    %cst_9 = arith.constant 0.000000e+00 : f32
    %16 = vector.broadcast %cst_9 : f32 to vector<8x128xf32>
    %17 = arith.subf %16, %15 : vector<8x128xf32>
    %18 = math.exp %17 : vector<8x128xf32>
    %c0_10 = arith.constant 0 : index
    %c0_11 = arith.constant 0 : index
    %19 = vector.load %arg7[%c0_10, %c0_11] : memref<8x128xf32, #tpu.memory_space<vmem>>, vector<8x128xf32>
    %20 = arith.mulf %13, %13 : vector<8x128xf32>
    %21 = arith.mulf %20, %18 : vector<8x128xf32>
    %22 = arith.addf %21, %4 : vector<8x128xf32>
    %cst_12 = arith.constant 5.000000e-01 : f32
    %23 = vector.broadcast %cst_12 : f32 to vector<8x128xf32>
    %24 = arith.mulf %22, %23 : vector<8x128xf32>
    %25 = arith.addf %19, %24 : vector<8x128xf32>
    %c0_13 = arith.constant 0 : index
    %c0_14 = arith.constant 0 : index
    %26 = vector.load %arg7[%c0_13, %c0_14] : memref<8x128xf32, #tpu.memory_space<vmem>>, vector<8x128xf32>
    tpu.vector_store %arg7[%c0_13, %c0_14], %25 {strides = array<i32>} : memref<8x128xf32, #tpu.memory_space<vmem>>, vector<8x128xf32>,
    %c0_i32_15 = arith.constant 0 : i32
    %27 = arith.cmpi eq, %arg1, %c0_i32_15 : i32
    %28 = arith.extui %27 : i1 to i32
    %c0_i32_16 = arith.constant 0 : i32
    %29 = arith.cmpi ne, %28, %c0_i32_16 : i32
    scf.if %29 {
      %c0_17 = arith.constant 0 : index
      %c0_18 = arith.constant 0 : index
      %30 = vector.load %arg7[%c0_17, %c0_18] : memref<8x128xf32, #tpu.memory_space<vmem>>, vector<8x128xf32>
      %cst_19 = arith.constant dense<0.000000e+00> : vector<8xf32>
      %31 = vector.multi_reduction <add>, %30, %cst_19 [1] : vector<8x128xf32> to vector<8xf32>
      %32 = vector.shape_cast %31 : vector<8xf32> to vector<8x1xf32>
      %cst_20 = arith.constant dense<0.000000e+00> : vector<1xf32>
      %33 = vector.multi_reduction <add>, %32, %cst_20 [0] : vector<8x1xf32> to vector<1xf32>
      %34 = vector.shape_cast %33 : vector<1xf32> to vector<1x1xf32>
      %35 = vector.shape_cast %34 : vector<1x1xf32> to vector<1x1xf32>
      %36 = vector.broadcast %35 : vector<1x1xf32> to vector<8x128xf32>
      %c0_21 = arith.constant 0 : index
      %c0_22 = arith.constant 0 : index
      %37 = vector.load %arg6[%c0_21, %c0_22] : memref<8x128xf32, #tpu.memory_space<vmem>>, vector<8x128xf32>
      tpu.vector_store %arg6[%c0_21, %c0_22], %36 {strides = array<i32>} : memref<8x128xf32, #tpu.memory_space<vmem>>, vector<8x128xf32>,
    } else {
    }
    return
  }
  func.func @transform_0(%arg0: i32, %arg1: i32) -> (i32, i32) {
    %c1_i32 = arith.constant 1 : i32
    %0 = arith.muli %arg0, %c1_i32 : i32
    %1 = arith.addi %0, %arg1 : i32
    %c0_i32 = arith.constant 0 : i32
    %c0_i32_0 = arith.constant 0 : i32
    return %1, %c0_i32 : i32, i32
  }
  func.func @transform_1(%arg0: i32, %arg1: i32) -> (i32, i32) {
    %c1_i32 = arith.constant 1 : i32
    %0 = arith.muli %arg0, %c1_i32 : i32
    %1 = arith.addi %0, %arg1 : i32
    %c0_i32 = arith.constant 0 : i32
    %c0_i32_0 = arith.constant 0 : i32
    return %1, %c0_i32 : i32, i32
  }
  func.func @transform_2(%arg0: i32, %arg1: i32) -> (i32, i32) {
    %c1_i32 = arith.constant 1 : i32
    %0 = arith.muli %arg0, %c1_i32 : i32
    %1 = arith.addi %0, %arg1 : i32
    %c0_i32 = arith.constant 0 : i32
    %c0_i32_0 = arith.constant 0 : i32
    return %1, %c0_i32 : i32, i32
  }
  func.func @transform_3(%arg0: i32, %arg1: i32) -> (i32, i32) {
    %c0_i32 = arith.constant 0 : i32
    %c0_i32_0 = arith.constant 0 : i32
    %c0_i32_1 = arith.constant 0 : i32
    return %c0_i32, %c0_i32_0 : i32, i32
  }
  func.func @transform_4(%arg0: i32, %arg1: i32) -> (i32, i32) {
    %c0_i32 = arith.constant 0 : i32
    %c0_i32_0 = arith.constant 0 : i32
    return %arg0, %c0_i32 : i32, i32
  }
}

</mosaic_0001>

<bundles_post_ra>
// kernel: reg_loss.1
= control target key start
LH: loop header
LB: loop body
LE: loop exit
PB: predicated region body
PF: predicated region fallthrough
CT: control target
= control target key end

     0   :  { %9 = vsyncpa [#allocation4], 0  ;;  %s982_s15 = smov [#allocation3]   ;;  %s1139_s0 = inlined_call_operand.vmem [shape: f32[8,128], index: 0, kind: input, shape index: {}]   ;;  %s1140_s1 = inlined_call_operand.vmem [shape: f32[8,128], index: 1, kind: input, shape index: {}]   ;;  %s1141_s2 = inlined_call_operand.vmem [shape: s32[8,1], index: 2, kind: input, shape index: {}]   ;;  %s1142_s3 = inlined_call_operand.hbm [shape: f32[64,128], index: 3, kind: input, shape index: {}]   ;;  %s1143_s4 = inlined_call_operand.vmem [shape: f32[8,128], index: 4, kind: output, shape index: {}]  }
   0x1   :  { %s39_s16 = sshll.u32 %s982_s15, 4  ;;  %s958_s19 = scalar_lea.hbm %s1142_s3, 1024  ;;  %s40_s16 = int_to_ptr.vmem [resolvable:$true] %s39_s16 }
   0x2   :  { %p959_p0 = scmp.ne.s32.totalorder %s1142_s3, %s958_s19  ;;  %p962_p1 = scmp.lt.u32.totalorder %s958_s19, %s1142_s3 }
   0x4   :  { %p964_p2 = pnand %p962_p1, %p959_p0 }
   0x6   :  { %967 = shalt.err (!%p964_p2)
}
   0x7   :  { %s968_s24 = scalar_lea.vmem %s40_s16, 1024  ;;  %p973_p4 = scmp.lt.s32.totalorder %s40_s16, %s40_s16 }
   0x8   :  { %p969_p3 = scmp.ne.s32.totalorder %s40_s16, %s968_s24  ;;  %p974_p5 = scmp.lt.s32.totalorder %s968_s24, %s968_s24 }
   0xa   :  { %p975_p6 = por %p974_p5, %p973_p4 }
   0xc   :  { %p976_p7 = pnand %p975_p6, %p969_p3 }
   0xe   :  { %979 = shalt.err (!%p976_p7)
}
   0xf   :  { %s983_s25 = smov 128   ;;  %s984_s26 = smov 8  }
  0x10   :  { %45 = dma.hbm_to_vmem [thread:$0]  %s1142_s3, 1024, %s40_s16, [#allocation4], %s983_s25, %s983_s25, %s984_s26  }
  0x11   :  { %980 = dma.done.wait [#allocation4], 1024  }
  0x12   :  { %981 = vsyncadd [#allocation4], 4294966272  ;;  %v985_v0 = vmov 0   ;;  %v986_v1 = vmov 0.0|0.0   ;;  %v89_v2 = vld [vmem:[%s1141_s2] sm:$0xff]  ;;  %v99_v4 = vld [vmem:[#allocation3 + $0x8] sm:$0xff] }
  0x13   :  { %955 = vset.pattern.permute.xlu0 %v985_v0  ;;  %903 = vmatprep.subr.bf16.mxu0 %v986_v1  ;;  %v98_v3 = vld [vmem:[#allocation3] sm:$0xff]  ;;  %v114_v6 = vand.u32 4294901760, %v99_v4  ;;  %v100_v7 = vld [vmem:[#allocation3 + $0x10] sm:$0xff]  ;;  %v101_v8 = vld [vmem:[#allocation3 + $0x18] sm:$0xff]  ;;  %vm987_vm0 = vmmov 0   ;;  %v988_v31 = vmov 0.0  }
  0x14   :  { %867 = vmatprep.subr.bf16.mxu1 %v986_v1  ;;  %93 = vperm.xlu0 %955, %v89_v2   ;;  %v111_v5 = vand.u32 4294901760, %v98_v3  ;;  %v102_v9 = vld [vmem:[#allocation3 + $0x20] sm:$0xff]  ;;  %v117_v10 = vand.u32 4294901760, %v100_v7  ;;  %v120_v11 = vand.u32 4294901760, %v101_v8  ;;  %v103_v12 = vld [vmem:[#allocation3 + $0x28] sm:$0xff]  ;;  %v104_v14 = vld [vmem:[#allocation3 + $0x30] sm:$0xff] }
  0x15   :  { %v123_v13 = vand.u32 4294901760, %v102_v9  ;;  %v105_v15 = vld [vmem:[#allocation3 + $0x38] sm:$0xff]  ;;  %v1035_v18 = vsub.f32 %v99_v4, %v114_v6  ;;  %v126_v19 = vand.u32 4294901760, %v103_v12  ;;  %v129_v25 = vand.u32 4294901760, %v104_v14  ;;  %826 = vmatprep.mubr.msk.f32.mxu0 %vm987_vm0, %v988_v31  ;;  %769 = vmatprep.mubr.msk.f32.mxu1 %vm987_vm0, %v988_v31 }
  0x16   :  { %v1031_v16 = vpack.c.bf16 %v114_v6, %v111_v5  ;;  %v1033_v17 = vsub.f32 %v98_v3, %v111_v5  ;;  %v1037_v20 = vsub.f32 %v100_v7, %v117_v10  ;;  %v1039_v21 = vsub.f32 %v101_v8, %v120_v11 }
  0x17   :  { %v1041_v22 = vsub.f32 %v102_v9, %v123_v13  ;;  %v1045_v23 = vpack.c.bf16 %v120_v11, %v117_v10  ;;  %v1047_v24 = vsub.f32 %v103_v12, %v126_v19  ;;  %v132_v26 = vand.u32 4294901760, %v105_v15 }
  0x18   :  { %905 = vmatpush3.bf16.msra.mxu0 %v1031_v16  ;;  %869 = vmatpush3.bf16.msra.mxu1 %v1031_v16  ;;  %v196_v27 = vand.u32 4294901760, %v1033_v17  ;;  %v203_v28 = vand.u32 4294901760, %v1035_v18  ;;  %v1053_v29 = vsub.f32 %v104_v14, %v129_v25  ;;  %v1065_v35 = vpack.c.bf16 %v126_v19, %v123_v13  ;;  %v88_v14 = vld [vmem:[%s1140_s1] sm:$0xff] }
  0x19   :  { %906 = vmatprep.subr.bf16.mxu0 %v986_v1  ;;  %870 = vmatprep.subr.bf16.mxu1 %v986_v1  ;;  %v1055_v30 = vsub.f32 %v105_v15, %v132_v26  ;;  %v210_v36 = vand.u32 4294901760, %v1037_v20  ;;  %v217_v37 = vand.u32 4294901760, %v1039_v21  ;;  %v1073_v43 = vpack.c.bf16 %v132_v26, %v129_v25 }
  0x1a   :  { %v916_v32 = vpack.c.bf16 %v203_v28, %v196_v27  ;;  %v197_v33 = vsub.f32 %v1033_v17, %v196_v27  ;;  %v204_v34 = vsub.f32 %v1035_v18, %v203_v28  ;;  %v224_v47 = vand.u32 4294901760, %v1041_v22 }
  0x1b   :  { %v919_v40 = vpack.c.bf16 %v217_v37, %v210_v36  ;;  %v211_v41 = vsub.f32 %v1037_v20, %v210_v36  ;;  %v218_v42 = vsub.f32 %v1039_v21, %v217_v37  ;;  %v231_v48 = vand.u32 4294901760, %v1047_v24 }
  0x1c   :  { %908 = vmatpush3.bf16.msra.mxu0 %v1045_v23  ;;  %872 = vmatpush3.bf16.msra.mxu1 %v1045_v23  ;;  %v198_v38 = vand.u32 4294901760, %v197_v33  ;;  %v205_v39 = vand.u32 4294901760, %v204_v34  ;;  %v225_v51 = vsub.f32 %v1041_v22, %v224_v47  ;;  %v238_v55 = vand.u32 4294901760, %v1053_v29 }
  0x1d   :  { %909 = vmatprep.subr.bf16.mxu0 %v986_v1  ;;  %873 = vmatprep.subr.bf16.mxu1 %v986_v1  ;;  %v212_v45 = vand.u32 4294901760, %v211_v41  ;;  %v219_v46 = vand.u32 4294901760, %v218_v42  ;;  %v922_v50 = vpack.c.bf16 %v231_v48, %v224_v47  ;;  %v232_v52 = vsub.f32 %v1047_v24, %v231_v48 }
  0x1e   :  { %v880_v44 = vpack.c.bf16 %v205_v39, %v198_v38  ;;  %v226_v53 = vand.u32 4294901760, %v225_v51  ;;  %v245_v56 = vand.u32 4294901760, %v1055_v30  ;;  %v239_v59 = vsub.f32 %v1053_v29, %v238_v55 }
  0x1f   :  { %v883_v49 = vpack.c.bf16 %v219_v46, %v212_v45  ;;  %v233_v54 = vand.u32 4294901760, %v232_v52  ;;  %v892_v0 = vpack.c.bf16 %v1035_v18, %v1033_v17  ;;  %v895_v2 = vpack.c.bf16 %v1039_v21, %v1037_v20  ;;  %v87_v20 = vld [vmem:[%s1139_s0] sm:$0xff] }
  0x20   :  { %911 = vmatpush3.bf16.msra.mxu0 %v1065_v35  ;;  %875 = vmatpush3.bf16.msra.mxu1 %v1065_v35  ;;  %v925_v58 = vpack.c.bf16 %v245_v56, %v238_v55  ;;  %v246_v60 = vsub.f32 %v1055_v30, %v245_v56  ;;  %v240_v61 = vand.u32 4294901760, %v239_v59  ;;  %v898_v3 = vpack.c.bf16 %v1047_v24, %v1041_v22 }
  0x21   :  { %912 = vmatprep.subr.bf16.mxu0 %v986_v1  ;;  %876 = vmatprep.subr.bf16.mxu1 %v986_v1  ;;  %v886_v57 = vpack.c.bf16 %v233_v54, %v226_v53  ;;  %v901_v4 = vpack.c.bf16 %v1055_v30, %v1053_v29  ;;  %v90_v5 = vlaneseq  ;;  %vm106_vm1 = vcmask 523264  }
  0x22   :  { %v247_v62 = vand.u32 4294901760, %v246_v60  ;;  %v648_v15 = vmax.f32 %v88_v14, -23.02585 }
  0x23   :  { %v91_v6 = vand.u32 127, %v90_v5 }
  0x24   :  { %914 = vmatpush3.bf16.msra.mxu0 %v1073_v43  ;;  %878 = vmatpush3.bf16.msra.mxu1 %v1073_v43  ;;  %v889_v63 = vpack.c.bf16 %v247_v62, %v240_v61 }
  0x25   :  { %915 = vmatprep.subr.bf16.mxu0 %v986_v1  ;;  %879 = vmatprep.subr.bf16.mxu1 %v986_v1 }
  0x93   :  { %v94_v7 = vpop.permute.xlu0 %93 }
  0x94   :  { %vm95_vm2 = vcmp.eq.s32.totalorder %v91_v6, %v94_v7 }
  0x95   :  { %v695_v8 = vsel %vm95_vm2, 1.0, %v988_v31 }
  0x96   :  { %v108_v9 = vsel %vm106_vm1, %v695_v8, 0 }
  0x97   :  { %v184_v10 = vsub.f32 %v108_v9, %v108_v9 }
  0x99   :  { %v185_v11 = vand.u32 4294901760, %v184_v10 }
  0x9b   :  { %827 = vmatmul.mubr.f32.vlgmr.msra.gmra.mrb[0].mxu0 %v185_v11  ;;  %v186_v12 = vsub.f32 %v184_v10, %v185_v11 }
  0x9c   :  { %917 = vmatpush3.bf16.msra.mxu0 %v916_v32  ;;  %845 = vmatprep.mubr.msk.f32.mxu0 %vm987_vm0, %v988_v31 }
  0x9d   :  { %918 = vmatprep.subr.bf16.mxu0 %v986_v1  ;;  %v187_v13 = vand.u32 4294901760, %v186_v12 }
  0x9f   :  { %770 = vmatmul.mubr.f32.vlgmr.msra.gmra.mrb[0].mxu1 %v187_v13 }
  0xa0   :  { %881 = vmatpush3.bf16.msra.mxu1 %v880_v44  ;;  %920 = vmatpush3.bf16.msra.mxu0 %v919_v40 }
  0xa1   :  { %882 = vmatprep.subr.bf16.mxu1 %v986_v1  ;;  %921 = vmatprep.subr.bf16.mxu0 %v986_v1 }
  0xa2   :  { %788 = vmatprep.mubr.msk.f32.mxu1 %vm987_vm0, %v988_v31 }
  0xa4   :  { %884 = vmatpush3.bf16.msra.mxu1 %v883_v49  ;;  %923 = vmatpush3.bf16.msra.mxu0 %v922_v50 }
  0xa5   :  { %885 = vmatprep.subr.bf16.mxu1 %v986_v1  ;;  %924 = vmatprep.subr.bf16.mxu0 %v986_v1 }
  0xa8   :  { %887 = vmatpush3.bf16.msra.mxu1 %v886_v57  ;;  %926 = vmatpush3.bf16.msra.mxu0 %v925_v58 }
  0xa9   :  { %888 = vmatprep.subr.bf16.mxu1 %v986_v1  ;;  %927 = vmatprep.subr.bf16.mxu0 %v986_v1 }
  0xab   :  { %846 = vmatmul.mubr.msk.f32.vlgmr.msra.gmra.mrb[0].mxu0 %vm106_vm1, %v695_v8 }
  0xac   :  { %890 = vmatpush3.bf16.msra.mxu1 %v889_v63  ;;  %929 = vmatpush3.bf16.msra.mxu0 %v1031_v16  ;;  %v649_v16 = vsub.f32 0.0, %v648_v15 }
  0xad   :  { %891 = vmatprep.subr.bf16.mxu1 %v986_v1  ;;  %930 = vmatprep.subr.bf16.mxu0 %v986_v1 }
  0xae   :  { %864 = vmatprep.mubr.msk.f32.mxu0 %vm987_vm0, %v988_v31  ;;  %v650_v17 = vmul.f32 1.442695, %v649_v16 }
  0xaf   :  { %789 = vmatmul.mubr.msk.f32.vlgmr.msra.gmra.mrb[0].mxu1 %vm106_vm1, %v695_v8 }
  0xb0   :  { %893 = vmatpush3.bf16.msra.mxu1 %v892_v0  ;;  %932 = vmatpush3.bf16.msra.mxu0 %v1045_v23  ;;  %956 = vpow2.f32 %v650_v17 }
  0xb1   :  { %894 = vmatprep.subr.bf16.mxu1 %v986_v1  ;;  %933 = vmatprep.subr.bf16.mxu0 %v986_v1 }
  0xb2   :  { %807 = vmatprep.mubr.msk.f32.mxu1 %vm987_vm0, %v988_v31 }
  0xb4   :  { %896 = vmatpush3.bf16.msra.mxu1 %v895_v2  ;;  %935 = vmatpush3.bf16.msra.mxu0 %v1065_v35 }
  0xb5   :  { %897 = vmatprep.subr.bf16.mxu1 %v986_v1  ;;  %936 = vmatprep.subr.bf16.mxu0 %v986_v1 }
  0xb8   :  { %899 = vmatpush3.bf16.msra.mxu1 %v898_v3  ;;  %938 = vmatpush3.bf16.msra.mxu0 %v1073_v43 }
  0xb9   :  { %900 = vmatprep.subr.bf16.mxu1 %v986_v1 }
  0xba   :  { %v957_v24 = vpop.eup %956 }
  0xbb   :  { %865 = vmatmul.mubr.msk.f32.vlgmr.msra.gmra.mrb[0].mxu0 %vm106_vm1, %v695_v8 }
  0xbc   :  { %902 = vmatpush3.bf16.msra.mxu1 %v901_v4 }
  0xbf   :  { %808 = vmatmul.mubr.f32.vlgmr.msra.gmra.mrb[0].mxu1 %v184_v10 }
 0x18e   :  { %v643_v18 = vpop.f32.mrb[0].mxu0 }
 0x18f   :  { %v866_v19 = vpop.f32.mrb[1].mxu0 }
 0x192   :  { %v388_v21 = vpop.f32.mrb[0].mxu1 }
 0x193   :  { %v939_v1 = vadd.f32 %v643_v18, %v388_v21  ;;  %v809_v22 = vpop.f32.mrb[1].mxu1 }
 0x195   :  { %v647_v23 = vsub.f32 %v939_v1, %v87_v20 }
 0x197   :  { %v653_v25 = vmul.f32 %v647_v23, %v647_v23 }
 0x199   :  { %v654_v26 = vmul.f32 %v957_v24, %v653_v25 }
 0x19b   :  { %v655_v27 = vadd.f32 %v654_v26, %v88_v14 }
 0x19d   :  { %v656_v28 = vmul.f32 0.5, %v655_v27 }
 0x19f   :  { %663 = vadd.xlane.f32.xlu0 %v656_v28 }
 0x22c   :  { %v664_v29 = vpop.xlane.xlu0 %663 }
 0x22d   :  { %v665_v30 = vrot.slane %v664_v29, 4 }
 0x22f   :  { %v666_v31 = vadd.f32 %v665_v30, %v664_v29 }
 0x231   :  { %v667_v32 = vrot.slane %v666_v31, 2 }
 0x233   :  { %v668_v33 = vadd.f32 %v667_v32, %v666_v31 }
 0x235   :  { %v669_v34 = vrot.slane %v668_v33, 1 }
 0x237   :  { %v670_v35 = vadd.f32 %v669_v34, %v668_v33 }
 0x239   :  { %671 = vst [vmem:[%s1143_s4] sm:$0xff] %v670_v35 }
 0x23a   :  { %676 = vsyncpa [#allocation4], 1 }

</bundles_post_ra>
